<compile_context>
chip_gen: v5e
topology: v5e:2x2
jax: 0.10.0
libtpu: 0.0.40
codegen_flags: <defaults>
</compile_context>

<pallas_src>
import jax
import jax.numpy as jnp
from jax import lax
from jax.experimental import pallas as pl
from jax.experimental.pallas import tpu as pltpu


def _round_up(n, m):
    return ((n + m - 1) // m) * m


# Two real heads (neighbour, same_type) padded to a full sublane group of 8 so
# all matmul / store shapes are tile-aligned and the output store is unmasked.
_NUM_HEAD_ROWS = 8


def _t2v_kernel(x_ref, w1_ref, b1_ref, wh_ref, bh_ref, out_ref):
    """One batch tile: out[8, TB] = sigmoid(W_heads @ relu(x @ W1 + b1)^T + b_heads)."""
    # (TB, 2E) bf16 @ (2E, 128) bf16 -> (TB, 128), f32 accumulate on the MXU.
    h = jnp.dot(x_ref[...], w1_ref[...], preferred_element_type=jnp.float32)
    h = jnp.maximum(h + b1_ref[...], 0.0)

    # Fused heads, lane-dense output: contract the hidden dim of BOTH operands
    # (A @ B^T form, same pattern as q.k^T in flash attention) so the result is
    # (8, TB) with the batch on the lane axis -> full-width vst, one MXU push.
    logits = lax.dot_general(
        wh_ref[...], h,
        dimension_numbers=(((1,), (1,)), ((), ())),
        preferred_element_type=jnp.float32,
    )
    out_ref[...] = jax.nn.sigmoid(logits + bh_ref[...]).astype(out_ref.dtype)


def traj2vec_forward(inputs, params, *, tile_b=512):
    """inputs: (B, 2) int token ids. Returns (is_neighbour, is_same_type), each (B, 1)."""
    emb_table = params["embedding"]          # (vocab, E)
    w1, b1 = params["w1"], params["b1"]      # (2E, 128), (1, 128)
    wn, bn = params["wn"], params["bn"]      # (128, 1), (1, 1)
    ws, bs = params["ws"], params["bs"]      # (128, 1), (1, 1)

    B = inputs.shape[0]
    E = emb_table.shape[1]
    H = w1.shape[1]
    NH = _NUM_HEAD_ROWS

    # Embedding lookup + view(-1, 2E).
    # TODO(synk): Pallas TPU has no general dynamic row-gather, so the embedding
    # lookup stays in XLA; only the matmul/activation hot path is in the kernel.
    x = jnp.take(emb_table, inputs.reshape(-1), axis=0).reshape(B, 2 * E)
    # Feed the MXU bf16 (f32 accumulate in-kernel); halves the dominant HBM read.
    x = x.astype(jnp.bfloat16)
    w1_bf16 = w1.astype(jnp.bfloat16)
    b1_f32 = b1.astype(jnp.float32)

    # Fuse the two 128->1 heads into one zero-padded (8, H) weight block and a
    # (8, 1) bias block (rows 0/1 real, rest zero -> sigmoid(0)=0.5, ignored).
    w_heads = jnp.zeros((NH, H), jnp.float32)
    w_heads = w_heads.at[0].set(wn[:, 0].astype(jnp.float32))
    w_heads = w_heads.at[1].set(ws[:, 0].astype(jnp.float32))
    b_heads = jnp.zeros((NH, 1), jnp.float32)
    b_heads = b_heads.at[0, 0].set(bn[0, 0].astype(jnp.float32))
    b_heads = b_heads.at[1, 0].set(bs[0, 0].astype(jnp.float32))

    # Tile the batch (TB is sweepable; 512-2048 all fit VMEM comfortably on
    # v5e/v6e/v7x since a tile is only TB*2E*2 bytes). Pad to a tile multiple.
    tb = min(tile_b, _round_up(B, 128))
    b_pad = _round_up(B, tb)
    if b_pad != B:
        x = jnp.pad(x, ((0, b_pad - B), (0, 0)))
    grid = (b_pad // tb,)

    cost = pl.CostEstimate(
        flops=2 * b_pad * (2 * E) * H + 2 * b_pad * H * NH,
        transcendentals=b_pad * NH,
        bytes_accessed=(b_pad * 2 * E * 2          # x (bf16)
                        + 2 * E * H * 2            # w1 (bf16)
                        + H * 4 + NH * H * 4 + NH * 4
                        + NH * b_pad * 4),         # output
    )

    out = pl.pallas_call(
        _t2v_kernel,
        out_shape=jax.ShapeDtypeStruct((NH, b_pad), jnp.float32),
        grid=grid,
        in_specs=[
            pl.BlockSpec((tb, 2 * E), lambda i: (i, 0), memory_space=pltpu.VMEM),
            pl.BlockSpec((2 * E, H), lambda i: (0, 0), memory_space=pltpu.VMEM),
            pl.BlockSpec((1, H), lambda i: (0, 0), memory_space=pltpu.VMEM),
            pl.BlockSpec((NH, H), lambda i: (0, 0), memory_space=pltpu.VMEM),
            pl.BlockSpec((NH, 1), lambda i: (0, 0), memory_space=pltpu.VMEM),
        ],
        out_specs=pl.BlockSpec((NH, tb), lambda i: (0, i), memory_space=pltpu.VMEM),
        compiler_params=pltpu.CompilerParams(
            dimension_semantics=("parallel",),
        ),
        cost_estimate=cost,
    )(x, w1_bf16, b1_f32, w_heads, b_heads)

    is_neighbour = out[0, :B][:, None]
    is_same_type = out[1, :B][:, None]
    return is_neighbour, is_same_type


def init_params(key, vocab_size, embedding_dim, hidden=128):
    """Deterministic parameter init matching the module's shapes."""
    k_emb, k_w1, k_b1, k_wn, k_bn, k_ws, k_bs = jax.random.split(key, 7)
    in1 = 2 * embedding_dim
    lim1 = 1.0 / jnp.sqrt(in1)
    limh = 1.0 / jnp.sqrt(hidden)
    return {
        # nn.Embedding default: N(0, 1)
        "embedding": jax.random.normal(k_emb, (vocab_size, embedding_dim), jnp.float32),
        # nn.Linear default: U(-1/sqrt(fan_in), 1/sqrt(fan_in)); stored as (in, out)
        "w1": jax.random.uniform(k_w1, (in1, hidden), jnp.float32, -lim1, lim1),
        "b1": jax.random.uniform(k_b1, (1, hidden), jnp.float32, -lim1, lim1),
        "wn": jax.random.uniform(k_wn, (hidden, 1), jnp.float32, -limh, limh),
        "bn": jax.random.uniform(k_bn, (1, 1), jnp.float32, -limh, limh),
        "ws": jax.random.uniform(k_ws, (hidden, 1), jnp.float32, -limh, limh),
        "bs": jax.random.uniform(k_bs, (1, 1), jnp.float32, -limh, limh),
    }


def _reference_forward(inputs, params):
    """Pure-JAX f32 reference (same math as the PyTorch module)."""
    E = params["embedding"].shape[1]
    embeds = jnp.take(params["embedding"], inputs.reshape(-1), axis=0)
    embeds = embeds.reshape(inputs.shape[0], 2 * E)
    h = jax.nn.relu(embeds @ params["w1"] + params["b1"])
    neigh = jax.nn.sigmoid(h @ params["wn"] + params["bn"])
    same = jax.nn.sigmoid(h @ params["ws"] + params["bs"])
    return neigh, same


if __name__ == "__main__":
    key = jax.random.PRNGKey(0)
    vocab_size = 64
    embedding_dim = 32
    batch = 8

    k_params, k_inp = jax.random.split(key)
    params = init_params(k_params, vocab_size, embedding_dim)

    # inputs: (B, 2) pairs of token ids, as the forward's view(-1, 2E) implies.
    inputs = jax.random.randint(k_inp, (batch, 2), 0, vocab_size, dtype=jnp.int32)

    fwd = jax.jit(traj2vec_forward)
    is_neighbour, is_same_type = fwd(inputs, params)
    jax.block_until_ready((is_neighbour, is_same_type))

    ref_n, ref_s = _reference_forward(inputs, params)
    assert is_neighbour.shape == (batch, 1) and is_same_type.shape == (batch, 1)
    # bf16 MXU inputs with f32 accumulate -> loosened tolerance vs. f32 reference.
    assert jnp.allclose(is_neighbour, ref_n, atol=1e-2, rtol=1e-2)
    assert jnp.allclose(is_same_type, ref_s, atol=1e-2, rtol=1e-2)

    print("KERNEL_OK")
</pallas_src>

<mosaic_0001>
module attributes {stable_mosaic.version = 11 : i64} {
  func.func @_t2v_kernel(%arg0: i32, %arg1: memref<128x64xbf16, #tpu.memory_space<vmem>>, %arg2: memref<64x128xbf16, #tpu.memory_space<vmem>>, %arg3: memref<1x128xf32, #tpu.memory_space<vmem>>, %arg4: memref<8x128xf32, #tpu.memory_space<vmem>>, %arg5: memref<8x1xf32, #tpu.memory_space<vmem>>, %arg6: memref<8x128xf32, #tpu.memory_space<vmem>>) attributes {dimension_semantics = [#tpu.dimension_semantics<parallel>], iteration_bounds = array<i64: 1>, scalar_prefetch = 0 : i64, scratch_operands = 0 : i64, tpu.core_type = #tpu.core_type<tc>, window_params = [{transform_indices = @transform_0, window_bounds = array<i64: 128, 64>}, {pipeline_mode = #tpu.pipeline_mode<synchronous>, transform_indices = @transform_1, window_bounds = array<i64: 64, 128>}, {pipeline_mode = #tpu.pipeline_mode<synchronous>, transform_indices = @transform_2, window_bounds = array<i64: 1, 128>}, {pipeline_mode = #tpu.pipeline_mode<synchronous>, transform_indices = @transform_3, window_bounds = array<i64: 8, 128>}, {pipeline_mode = #tpu.pipeline_mode<synchronous>, transform_indices = @transform_4, window_bounds = array<i64: 8, 1>}, {transform_indices = @transform_5, window_bounds = array<i64: 8, 128>}]} {
    %c0 = arith.constant 0 : index
    %c0_0 = arith.constant 0 : index
    %0 = vector.load %arg1[%c0, %c0_0] : memref<128x64xbf16, #tpu.memory_space<vmem>>, vector<128x64xbf16>
    %c0_1 = arith.constant 0 : index
    %c0_2 = arith.constant 0 : index
    %1 = vector.load %arg2[%c0_1, %c0_2] : memref<64x128xbf16, #tpu.memory_space<vmem>>, vector<64x128xbf16>
    %cst = arith.constant dense<0.000000e+00> : vector<128x128xf32>
    %2 = tpu.matmul %0, %1, %cst {dimension_numbers = #tpu.dot_dimension_numbers<[1], [0], [0], [1], [0, 0, 1, 1], [], []>} : vector<128x64xbf16>, vector<64x128xbf16>, vector<128x128xf32> -> vector<128x128xf32>
    %c0_3 = arith.constant 0 : index
    %c0_4 = arith.constant 0 : index
    %3 = vector.load %arg3[%c0_3, %c0_4] : memref<1x128xf32, #tpu.memory_space<vmem>>, vector<1x128xf32>
    %4 = vector.broadcast %3 : vector<1x128xf32> to vector<128x128xf32>
    %5 = arith.addf %2, %4 : vector<128x128xf32>
    %cst_5 = arith.constant 0.000000e+00 : f32
    %6 = vector.broadcast %cst_5 : f32 to vector<128x128xf32>
    %7 = arith.maximumf %5, %6 : vector<128x128xf32>
    %c0_6 = arith.constant 0 : index
    %c0_7 = arith.constant 0 : index
    %8 = vector.load %arg4[%c0_6, %c0_7] : memref<8x128xf32, #tpu.memory_space<vmem>>, vector<8x128xf32>
    %cst_8 = arith.constant dense<0.000000e+00> : vector<8x128xf32>
    %9 = tpu.matmul %8, %7, %cst_8 {dimension_numbers = #tpu.dot_dimension_numbers<[1], [1], [0], [0], [0, 0, 1, 0], [], []>} : vector<8x128xf32>, vector<128x128xf32>, vector<8x128xf32> -> vector<8x128xf32>
    %c0_9 = arith.constant 0 : index
    %c0_10 = arith.constant 0 : index
    %10 = vector.load %arg5[%c0_9, %c0_10] : memref<8x1xf32, #tpu.memory_space<vmem>>, vector<8x1xf32>
    %11 = vector.broadcast %10 : vector<8x1xf32> to vector<8x128xf32>
    %12 = arith.addf %9, %11 : vector<8x128xf32>
    %13 = arith.negf %12 : vector<8x128xf32>
    %14 = math.exp %13 : vector<8x128xf32>
    %cst_11 = arith.constant 1.000000e+00 : f32
    %15 = vector.broadcast %cst_11 : f32 to vector<8x128xf32>
    %16 = arith.addf %15, %14 : vector<8x128xf32>
    %17 = arith.divf %15, %16 : vector<8x128xf32>
    %c0_12 = arith.constant 0 : index
    %c0_13 = arith.constant 0 : index
    %18 = vector.load %arg6[%c0_12, %c0_13] : memref<8x128xf32, #tpu.memory_space<vmem>>, vector<8x128xf32>
    tpu.vector_store %arg6[%c0_12, %c0_13], %17 {strides = array<i32>} : memref<8x128xf32, #tpu.memory_space<vmem>>, vector<8x128xf32>,
    return
  }
  func.func @transform_0(%arg0: i32) -> (i32, i32) {
    %c0_i32 = arith.constant 0 : i32
    %c0_i32_0 = arith.constant 0 : i32
    return %arg0, %c0_i32 : i32, i32
  }
  func.func @transform_1(%arg0: i32) -> (i32, i32) {
    %c0_i32 = arith.constant 0 : i32
    %c0_i32_0 = arith.constant 0 : i32
    %c0_i32_1 = arith.constant 0 : i32
    return %c0_i32, %c0_i32_0 : i32, i32
  }
  func.func @transform_2(%arg0: i32) -> (i32, i32) {
    %c0_i32 = arith.constant 0 : i32
    %c0_i32_0 = arith.constant 0 : i32
    %c0_i32_1 = arith.constant 0 : i32
    return %c0_i32, %c0_i32_0 : i32, i32
  }
  func.func @transform_3(%arg0: i32) -> (i32, i32) {
    %c0_i32 = arith.constant 0 : i32
    %c0_i32_0 = arith.constant 0 : i32
    %c0_i32_1 = arith.constant 0 : i32
    return %c0_i32, %c0_i32_0 : i32, i32
  }
  func.func @transform_4(%arg0: i32) -> (i32, i32) {
    %c0_i32 = arith.constant 0 : i32
    %c0_i32_0 = arith.constant 0 : i32
    %c0_i32_1 = arith.constant 0 : i32
    return %c0_i32, %c0_i32_0 : i32, i32
  }
  func.func @transform_5(%arg0: i32) -> (i32, i32) {
    %c0_i32 = arith.constant 0 : i32
    %c0_i32_0 = arith.constant 0 : i32
    return %c0_i32, %arg0 : i32, i32
  }
}

</mosaic_0001>

<bundles_post_ra>
// kernel: traj2vec_forward.1
= control target key start
LH: loop header
LB: loop body
LE: loop exit
PB: predicated region body
PF: predicated region fallthrough
CT: control target
= control target key end

     0   :  { %vm113_vm0 = vcmask 523264   ;;  %v338_v49 = vmov 0   ;;  %s417_s1 = inlined_call_operand.vmem [shape: bf16[64,128], index: 1, kind: input, shape index: {}]   ;;  %s418_s2 = inlined_call_operand.vmem [shape: f32[1,128], index: 2, kind: input, shape index: {}]   ;;  %s419_s0 = inlined_call_operand.vmem [shape: bf16[128,64], index: 0, kind: input, shape index: {}]   ;;  %s420_s4 = inlined_call_operand.vmem [shape: f32[8,1], index: 4, kind: input, shape index: {}]   ;;  %s421_s3 = inlined_call_operand.vmem [shape: f32[8,128], index: 3, kind: input, shape index: {}]   ;;  %s422_s5 = inlined_call_operand.vmem [shape: f32[8,128], index: 5, kind: output, shape index: {}]  }
   0x1   :  { %v322_v0 = vld [vmem:[%s417_s1 + $0x18] sm:$0xff]  ;;  %v321_v1 = vld [vmem:[%s417_s1 + $0x10] sm:$0xff]  ;;  %v320_v2 = vld [vmem:[%s417_s1 + $0x8] sm:$0xff]  ;;  %332 = vset.pattern.permute.xlu0 %v338_v49 }
   0x2   :  { %323 = vmatpush.bf16.msra.mxu2 %v322_v0  ;;  %324 = vmatpush.bf16.msra.mxu3 %v322_v0  ;;  %v319_v3 = vld [vmem:[%s417_s1] sm:$0xff]  ;;  %v314_v4 = vld [vmem:[%s419_s0 + $0x18] sm:$0xff]  ;;  %v317_v5 = vld [vmem:[%s419_s0 + $0x30] sm:$0xff] }
   0x3   :  { %142 = vmatpush.bf16.msra.mxu0 %v322_v0  ;;  %v311_v6 = vld [vmem:[%s419_s0] sm:$0xff]  ;;  %v318_v8 = vld [vmem:[%s419_s0 + $0x38] sm:$0xff]  ;;  %v312_v9 = vld [vmem:[%s419_s0 + $0x8] sm:$0xff] }
   0x4   :  { %v315_v7 = vld [vmem:[%s419_s0 + $0x20] sm:$0xff]  ;;  %v316_v10 = vld [vmem:[%s419_s0 + $0x28] sm:$0xff]  ;;  %v313_v11 = vld [vmem:[%s419_s0 + $0x10] sm:$0xff] }
   0x5   :  { %v333_v20 = vld [vmem:[%s418_s2] ss:$0 sm:$0xff] }
   0x6   :  { %325 = vmatpush.bf16.msra.mxu2 %v321_v1  ;;  %326 = vmatpush.bf16.msra.mxu3 %v321_v1  ;;  %v204_v48 = vld [vmem:[%s420_s4] sm:$0xff] }
   0x7   :  { %143 = vmatpush.bf16.msra.mxu0 %v321_v1  ;;  %207 = vperm.xlu0 %332, %v204_v48   ;;  %v203_v63 = vld [vmem:[%s421_s3] sm:$0xff] }
   0xa   :  { %327 = vmatpush.bf16.msra.mxu2 %v320_v2  ;;  %328 = vmatpush.bf16.msra.mxu3 %v320_v2 }
   0xb   :  { %144 = vmatpush.bf16.msra.mxu0 %v320_v2 }
   0xe   :  { %329 = vmatpush.bf16.msra.mxu2 %v319_v3  ;;  %330 = vmatpush.bf16.msra.mxu3 %v319_v3 }
   0xf   :  { %145 = vmatpush.bf16.msra.mxu0 %v319_v3 }
  0x11   :  { %305 = vmatmul.msk.bf16.vlgmr.msra.gmra.mxu2 %vm113_vm0, %v314_v4  ;;  %308 = vmatmul.msk.bf16.vlgmr.msra.gmra.mxu3 %vm113_vm0, %v317_v5 }
  0x12   :  { %302 = vmatmul.msk.bf16.vlgmr.msra.gmra.mxu0 %vm113_vm0, %v311_v6 }
  0x21   :  { %306 = vmatmul.msk.bf16.gmra.mxu2 %vm113_vm0, %v315_v7  ;;  %309 = vmatmul.msk.bf16.gmra.mxu3 %vm113_vm0, %v318_v8 }
  0x22   :  { %303 = vmatmul.msk.bf16.gmra.mxu0 %vm113_vm0, %v312_v9 }
  0x31   :  { %307 = vmatmul.msk.bf16.gmra.mxu2 %vm113_vm0, %v316_v10 }
  0x32   :  { %304 = vmatmul.msk.bf16.gmra.mxu0 %vm113_vm0, %v313_v11 }
  0x79   :  { %v208_v0 = vpop.permute.xlu0 %207 }
  0x8f   :  { %v147_v16 = vpop.f32.mrf.mxu0 }
  0x90   :  { %v148_v60 = vadd.f32 %v333_v20, %v147_v16 }
  0x92   :  { %v187_v62 = vmax.f32 %v148_v60, 0.0 }
  0x94   :  { %v162_v12 = vpop.f32.mrf.mxu2  ;;  %v177_v13 = vpop.f32.mrf.mxu3 }
  0x95   :  { %v178_v30 = vadd.f32 %v333_v20, %v177_v13  ;;  %v163_v45 = vadd.f32 %v333_v20, %v162_v12 }
  0x97   :  { %v149_v19 = vpop.f32.mrf.mxu0  ;;  %v199_v32 = vmax.f32 %v178_v30, 0.0  ;;  %v193_v50 = vmax.f32 %v163_v45, 0.0 }
  0x98   :  { %v150_v58 = vadd.f32 %v333_v20, %v149_v19 }
  0x9a   :  { %v188_v61 = vmax.f32 %v150_v58, 0.0 }
  0x9c   :  { %v164_v14 = vpop.f32.mrf.mxu2  ;;  %v179_v15 = vpop.f32.mrf.mxu3 }
  0x9d   :  { %v180_v27 = vadd.f32 %v333_v20, %v179_v15  ;;  %v165_v43 = vadd.f32 %v333_v20, %v164_v14 }
  0x9f   :  { %v152_v26 = vpop.f32.mrf.mxu0  ;;  %v200_v31 = vmax.f32 %v180_v27, 0.0  ;;  %v194_v46 = vmax.f32 %v165_v43, 0.0 }
  0xa0   :  { %v153_v56 = vadd.f32 %v333_v20, %v152_v26 }
  0xa2   :  { %v189_v59 = vmax.f32 %v153_v56, 0.0 }
  0xa4   :  { %v167_v17 = vpop.f32.mrf.mxu2  ;;  %v182_v18 = vpop.f32.mrf.mxu3 }
  0xa5   :  { %v183_v24 = vadd.f32 %v333_v20, %v182_v18  ;;  %v168_v41 = vadd.f32 %v333_v20, %v167_v17 }
  0xa7   :  { %v201_v28 = vmax.f32 %v183_v24, 0.0  ;;  %v154_v33 = vpop.f32.mrf.mxu0  ;;  %v195_v44 = vmax.f32 %v168_v41, 0.0 }
  0xa8   :  { %v155_v54 = vadd.f32 %v333_v20, %v154_v33 }
  0xaa   :  { %v190_v57 = vmax.f32 %v155_v54, 0.0 }
  0xac   :  { %v169_v21 = vpop.f32.mrf.mxu2  ;;  %v184_v22 = vpop.f32.mrf.mxu3 }
  0xad   :  { %v185_v23 = vadd.f32 %v333_v20, %v184_v22  ;;  %v170_v38 = vadd.f32 %v333_v20, %v169_v21 }
  0xaf   :  { %v202_v25 = vmax.f32 %v185_v23, 0.0  ;;  %v157_v40 = vpop.f32.mrf.mxu0  ;;  %v196_v42 = vmax.f32 %v170_v38, 0.0 }
  0xb0   :  { %v158_v52 = vadd.f32 %v333_v20, %v157_v40 }
  0xb1   :  { %210 = vmatpush.xpose.msra.mxu1 %v202_v25 }
  0xb2   :  { %v191_v55 = vmax.f32 %v158_v52, 0.0 }
  0xb4   :  { %v172_v29 = vpop.f32.mrf.mxu2 }
  0xb5   :  { %211 = vmatpush.xpose.msra.mxu1 %v201_v28  ;;  %v173_v36 = vadd.f32 %v333_v20, %v172_v29 }
  0xb7   :  { %v197_v39 = vmax.f32 %v173_v36, 0.0  ;;  %v159_v47 = vpop.f32.mrf.mxu0 }
  0xb8   :  { %v160_v51 = vadd.f32 %v333_v20, %v159_v47 }
  0xb9   :  { %212 = vmatpush.xpose.msra.mxu1 %v200_v31 }
  0xba   :  { %v192_v53 = vmax.f32 %v160_v51, 0.0 }
  0xbc   :  { %v174_v34 = vpop.f32.mrf.mxu2 }
  0xbd   :  { %v175_v35 = vadd.f32 %v333_v20, %v174_v34  ;;  %213 = vmatpush.xpose.msra.mxu1 %v199_v32 }
  0xbf   :  { %v198_v37 = vmax.f32 %v175_v35, 0.0 }
  0xc1   :  { %214 = vmatpush.xpose.msra.mxu1 %v198_v37 }
  0xc5   :  { %215 = vmatpush.xpose.msra.mxu1 %v197_v39 }
  0xc9   :  { %216 = vmatpush.xpose.msra.mxu1 %v196_v42 }
  0xcd   :  { %217 = vmatpush.xpose.msra.mxu1 %v195_v44 }
  0xd1   :  { %218 = vmatpush.xpose.msra.mxu1 %v194_v46 }
  0xd5   :  { %219 = vmatpush.xpose.msra.mxu1 %v193_v50 }
  0xd9   :  { %220 = vmatpush.xpose.msra.mxu1 %v192_v53 }
  0xdd   :  { %221 = vmatpush.xpose.msra.mxu1 %v191_v55 }
  0xe1   :  { %222 = vmatpush.xpose.msra.mxu1 %v190_v57 }
  0xe5   :  { %223 = vmatpush.xpose.msra.mxu1 %v189_v59 }
  0xe9   :  { %224 = vmatpush.xpose.msra.mxu1 %v188_v61 }
  0xed   :  { %225 = vmatpush.xpose.msra.mxu1 %v187_v62 }
  0xf0   :  { %226 = vmatmul.f32.vlgmr.msra.gmra.mxu1 %v203_v63 }
 0x16d   :  { %v227_v1 = vpop.f32.mrf.mxu1 }
 0x16e   :  { %v228_v2 = vadd.f32 %v227_v1, %v208_v0 }
 0x170   :  { %v310_v3 = vmul.f32 -1.442695, %v228_v2 }
 0x172   :  { %334 = vpow2.f32 %v310_v3 }
 0x178   :  { %v335_v4 = vpop.eup %334 }
 0x179   :  { %v233_v5 = vadd.f32 1.0, %v335_v4 }
 0x17b   :  { %336 = vrcp.f32 %v233_v5  ;;  %v245_v9 = vand.u32 2147483648, %v233_v5  ;;  %v243_v11 = vand.u32 2147483647, %v233_v5  ;;  %vm239_vm2 = vweird.f32 %v233_v5 }
 0x17d   :  { %v246_v13 = vor.u32 1.1754944e-38, %v245_v9  ;;  %vm244_vm4 = vcmp.eq.f32.partialorder %v243_v11, 8.507059e+37 }
 0x181   :  { %v337_v6 = vpop.eup %336 }
 0x182   :  { %v235_v7 = vmul.f32 %v337_v6, %v233_v5  ;;  %vm240_vm1 = vweird.f32 %v337_v6 }
 0x183   :  { %vm241_vm3 = vmor %vm239_vm2, %vm240_vm1 }
 0x184   :  { %v236_v8 = vsub.f32 1.0, %v235_v7 }
 0x186   :  { %v237_v10 = vmul.f32 %v337_v6, %v236_v8 }
 0x188   :  { %v238_v12 = vadd.f32 %v337_v6, %v237_v10 }
 0x18a   :  { %v242_v14 = vsel %vm241_vm3, %v337_v6, %v238_v12 }
 0x18b   :  { %v247_v15 = vsel %vm244_vm4, %v246_v13, %v242_v14 }
 0x18c   :  { %249 = vst [vmem:[%s422_s5] sm:$0xff] %v247_v15 }

</bundles_post_ra>
